<compile_context>
chip_gen: v7x
topology: tpu7x:2x2x1
jax: 0.10.0
libtpu: 0.0.40
codegen_flags: <defaults>
</compile_context>

<pallas_src>
import functools

import jax
import jax.numpy as jnp
from jax import lax
from jax.experimental import pallas as pl
from jax.experimental.pallas import tpu as pltpu


# Contract x[.., K] with weight[out, K] along K (PyTorch nn.Linear layout).
_K_CONTRACT = (((1,), (1,)), ((), ()))


def _linear_single_kernel(x_ref, w_ref, b_ref, o_ref, *, apply_sigmoid):
    """Whole (tiny) problem resident in VMEM: one matmul + fused epilogue."""
    out = lax.dot_general(
        x_ref[...],
        w_ref[...],
        dimension_numbers=_K_CONTRACT,
        preferred_element_type=jnp.float32,
    )
    out = out + b_ref[...].astype(jnp.float32)
    if apply_sigmoid:
        out = jax.nn.sigmoid(out)
    o_ref[...] = out.astype(o_ref.dtype)


def _linear_tiled_kernel(x_ref, w_ref, b_ref, o_ref, acc_ref, *, apply_sigmoid):
    """Tiled path: grid = (M//tm, N//tn, K//tk); f32 scratch accumulator."""
    k = pl.program_id(2)

    partial = lax.dot_general(
        x_ref[...],
        w_ref[...],
        dimension_numbers=_K_CONTRACT,
        preferred_element_type=jnp.float32,
    )

    @pl.when(k == 0)
    def _():
        acc_ref[...] = partial          # no zero-init store+load

    @pl.when(k != 0)
    def _():
        acc_ref[...] += partial

    @pl.when(k == pl.num_programs(2) - 1)
    def _():
        out = acc_ref[...] + b_ref[...].astype(jnp.float32)
        if apply_sigmoid:
            out = jax.nn.sigmoid(out)
        o_ref[...] = out.astype(o_ref.dtype)


def _choose_tk(K, target=2048, align=128):
    """Pick reduction tile.  Returns (tk, K_padded); tk divides K_padded exactly.

    Prefers the largest 128-aligned divisor of K up to `target`.  If K has no
    128-aligned divisor (awkward hidden sizes), K is padded up to a multiple of
    128 in the wrapper (zero padding is exact for the dot)."""
    if K <= target:
        return K, K                      # single reduction step; full-dim block
    t = (target // align) * align
    while t >= align:
        if K % t == 0:
            return t, K
        t -= align
    # No aligned divisor: pad K to a multiple of `align` and retry.
    Kp = ((K + align - 1) // align) * align
    t = (target // align) * align
    while t >= align:
        if Kp % t == 0:
            return t, Kp
        t -= align
    return align, Kp


def baseline_nn_forward(
    x,
    weight,
    bias,
    eval=False,
    *,
    tm=None,
    tn=None,
    tk=None,
    single_block_max_bytes=2 * 1024 * 1024,
):
    """Pallas equivalent of baseline_NN.forward.

    x:      [B, in_num]        float32
    weight: [out_num, in_num]  float32  (PyTorch nn.Linear layout, NOT transposed)
    bias:   [out_num]          float32
    """
    assert x.ndim == 2
    B, K = x.shape
    N, K2 = weight.shape
    assert K == K2
    assert bias.shape == (N,)

    b2d = bias.reshape(1, N)
    apply_sigmoid = bool(eval)

    itemsize = jnp.dtype(x.dtype).itemsize
    total_bytes = (B * K + N * K + N + B * N) * itemsize
    tiles_given = any(t is not None for t in (tm, tn, tk))

    # ---- Fast path: tiny problems, whole thing in VMEM, single invocation ----
    # (Kept small so medium problems go to the tiled path and can be sharded
    #  across both TensorCores on v7x via the "parallel" grid axes.)
    if total_bytes <= single_block_max_bytes and not tiles_given:
        kernel = functools.partial(
            _linear_single_kernel, apply_sigmoid=apply_sigmoid
        )
        return pl.pallas_call(
            kernel,
            out_shape=jax.ShapeDtypeStruct((B, N), x.dtype),
            in_specs=[
                pl.BlockSpec(memory_space=pltpu.MemorySpace.VMEM),  # x
                pl.BlockSpec(memory_space=pltpu.MemorySpace.VMEM),  # weight
                pl.BlockSpec(memory_space=pltpu.MemorySpace.VMEM),  # bias
            ],
            out_specs=pl.BlockSpec(memory_space=pltpu.MemorySpace.VMEM),
        )(x, weight, b2d)

    # ---- General tiled path ----
    tn_default = tn is None
    tm = min(B, 512) if tm is None else min(tm, B)
    tn = min(N, 512) if tn is None else min(tn, N)

    if tk is None:
        tk, Kp = _choose_tk(K)
    else:
        Kp = pl.cdiv(K, tk) * tk
    if Kp != K:
        # Zero-pad the reduction dim (exact: zeros contribute nothing).
        x = jnp.pad(x, ((0, 0), (0, Kp - K)))
        weight = jnp.pad(weight, ((0, 0), (0, Kp - K)))
    assert Kp % tk == 0

    # v7x has 2 TensorCores: if the M axis has only one block, make sure the
    # N ("parallel") axis has at least 2 blocks so both cores get work.
    if tn_default and pl.cdiv(B, tm) == 1 and N >= 256:
        tn = min(tn, max(128, (N // 2) // 128 * 128))

    grid = (pl.cdiv(B, tm), pl.cdiv(N, tn), Kp // tk)

    # Explicit VMEM budget: double-buffered x/W/bias tiles + double-buffered
    # output tile + f32 scratch accumulator.  Floor 16 MiB (v5e scoped default
    # is only 16 MiB), cap 44 MiB (v7x has 64 MiB physical VMEM per core).
    tile_bytes = itemsize * (2 * (tm * tk + tn * tk + tn) + 2 * tm * tn) + 4 * tm * tn
    vmem_limit = int(min(max(2 * tile_bytes, 16 << 20), 44 << 20))

    kernel = functools.partial(_linear_tiled_kernel, apply_sigmoid=apply_sigmoid)

    # TODO(synk): verify via pl.lower_as_mlir that the K-minor contraction on
    # the (tn, tk) weight tile does not emit per-tile XLU transposes on large
    # tiles; if it does, pre-transpose the weight once outside the kernel.
    return pl.pallas_call(
        kernel,
        out_shape=jax.ShapeDtypeStruct((B, N), x.dtype),
        grid_spec=pltpu.PrefetchScalarGridSpec(
            num_scalar_prefetch=0,
            grid=grid,
            in_specs=[
                pl.BlockSpec((tm, tk), lambda i, j, k: (i, k)),  # x tile
                pl.BlockSpec((tn, tk), lambda i, j, k: (j, k)),  # W tile ([out,in])
                pl.BlockSpec((1, tn), lambda i, j, k: (0, j)),   # bias tile
            ],
            out_specs=pl.BlockSpec((tm, tn), lambda i, j, k: (i, j)),
            scratch_shapes=[pltpu.VMEM((tm, tn), jnp.float32)],
        ),
        compiler_params=pltpu.CompilerParams(
            dimension_semantics=("parallel", "parallel", "arbitrary"),
            vmem_limit_bytes=vmem_limit,
        ),
    )(x, weight, b2d)


if __name__ == "__main__":
    # Small shapes consistent with the module (in_num = embed_dim).
    B, in_num, out_num = 8, 256, 128

    key = jax.random.PRNGKey(0)
    kx, kw, kb = jax.random.split(key, 3)

    bound = 1.0 / jnp.sqrt(in_num)
    weight = jax.random.uniform(
        kw, (out_num, in_num), jnp.float32, minval=-bound, maxval=bound
    )
    bias = jax.random.uniform(
        kb, (out_num,), jnp.float32, minval=-bound, maxval=bound
    )
    x = jax.random.normal(kx, (B, in_num), jnp.float32)

    # Plain-JAX reference.
    ref = x @ weight.T + bias
    ref_eval = jax.nn.sigmoid(ref)

    # Tiny-problem single-block path (grid-free, fused bias/sigmoid epilogue).
    out = jax.block_until_ready(baseline_nn_forward(x, weight, bias, eval=False))
    out_eval = jax.block_until_ready(baseline_nn_forward(x, weight, bias, eval=True))
    assert jnp.allclose(out, ref, atol=1e-5, rtol=1e-5)
    assert jnp.allclose(out_eval, ref_eval, atol=1e-5, rtol=1e-5)

    # Tiled path with explicit tiles (two K reduction steps, scratch accumulator).
    out_tiled = jax.block_until_ready(
        baseline_nn_forward(x, weight, bias, eval=True, tm=8, tn=128, tk=128)
    )
    assert jnp.allclose(out_tiled, ref_eval, atol=1e-5, rtol=1e-5)

    # Tiled path with default tile selection (force past the single-block gate).
    out_tiled_default = jax.block_until_ready(
        baseline_nn_forward(x, weight, bias, eval=False, single_block_max_bytes=0)
    )
    assert jnp.allclose(out_tiled_default, ref, atol=1e-5, rtol=1e-5)

    assert out.shape == (B, out_num) and out.dtype == jnp.float32
    print("KERNEL_OK")
</pallas_src>

<mosaic_0001>
module attributes {stable_mosaic.version = 11 : i64} {
  func.func @_linear_single_kernel(%arg0: memref<8x256xf32, #tpu.memory_space<vmem>>, %arg1: memref<128x256xf32, #tpu.memory_space<vmem>>, %arg2: memref<1x128xf32, #tpu.memory_space<vmem>>, %arg3: memref<8x128xf32, #tpu.memory_space<vmem>>) attributes {dimension_semantics = [], scalar_prefetch = 0 : i64, scratch_operands = 0 : i64, tpu.core_type = #tpu.core_type<tc>} {
    %c0 = arith.constant 0 : index
    %c0_0 = arith.constant 0 : index
    %0 = vector.load %arg0[%c0, %c0_0] : memref<8x256xf32, #tpu.memory_space<vmem>>, vector<8x256xf32>
    %c0_1 = arith.constant 0 : index
    %c0_2 = arith.constant 0 : index
    %1 = vector.load %arg1[%c0_1, %c0_2] : memref<128x256xf32, #tpu.memory_space<vmem>>, vector<128x256xf32>
    %cst = arith.constant dense<0.000000e+00> : vector<8x128xf32>
    %2 = tpu.matmul %0, %1, %cst {dimension_numbers = #tpu.dot_dimension_numbers<[1], [1], [0], [0], [0, 0, 1, 0], [], []>} : vector<8x256xf32>, vector<128x256xf32>, vector<8x128xf32> -> vector<8x128xf32>
    %c0_3 = arith.constant 0 : index
    %c0_4 = arith.constant 0 : index
    %3 = vector.load %arg2[%c0_3, %c0_4] : memref<1x128xf32, #tpu.memory_space<vmem>>, vector<1x128xf32>
    %4 = vector.broadcast %3 : vector<1x128xf32> to vector<8x128xf32>
    %5 = arith.addf %2, %4 : vector<8x128xf32>
    %c0_5 = arith.constant 0 : index
    %c0_6 = arith.constant 0 : index
    %6 = vector.load %arg3[%c0_5, %c0_6] : memref<8x128xf32, #tpu.memory_space<vmem>>, vector<8x128xf32>
    tpu.vector_store %arg3[%c0_5, %c0_6], %5 {strides = array<i32>} : memref<8x128xf32, #tpu.memory_space<vmem>>, vector<8x128xf32>,
    return
  }
}

</mosaic_0001>

<bundles_post_ra>
// kernel: tpu_custom_call.1
= control target key start
LH: loop header
LB: loop body
LE: loop exit
PB: predicated region body
PF: predicated region fallthrough
CT: control target
= control target key end

     0   :  { %8 = vsyncpa [#allocation3], 0  ;;  %s350_s0 = inlined_call_operand.hbm [shape: f32[8,256], index: 0, kind: input, shape index: {}]   ;;  %s351_s1 = inlined_call_operand.hbm [shape: f32[128,256], index: 1, kind: input, shape index: {}]   ;;  %s352_s2 = inlined_call_operand.vmem [shape: f32[1,128], index: 2, kind: input, shape index: {}]   ;;  %s353_s3 = inlined_call_operand.hbm [shape: f32[8,128], index: 3, kind: output, shape index: {}]  }
   0x1   :  { %9 = vsyncpa [#allocation6], 0 }
   0x2   :  { %10 = vsyncpa [#allocation4], 0  ;;  %s279_s12 = smov [#allocation2]   ;;  %s280_s14 = smov [#allocation5]  }
   0x3   :  { %s17_s13 = sshll.u32 %s279_s12, 4  ;;  %s26_s15 = sshll.u32 %s280_s14, 4  ;;  %s18_s13 = int_to_ptr.vmem [resolvable:$true] %s17_s13  ;;  %s304_s15 = int_to_ptr.vmem [resolvable:$true] %s26_s15 }
   0x4   :  { %s207_s18 = scalar_lea.hbm %s350_s0, 256 }
   0x5   :  { %p208_p0 = scmp.ne.s32.totalorder %s350_s0, %s207_s18  ;;  %p211_p1 = scmp.lt.u32.totalorder %s207_s18, %s350_s0 }
   0x7   :  { %p213_p2 = pnand %p211_p1, %p208_p0 }
   0x9   :  { %216 = shalt.err (!%p213_p2)
}
   0xa   :  { %s217_s23 = scalar_lea.vmem %s18_s13, 256  ;;  %p222_p4 = scmp.lt.s32.totalorder %s18_s13, %s18_s13 }
   0xb   :  { %p218_p3 = scmp.ne.s32.totalorder %s18_s13, %s217_s23  ;;  %p223_p5 = scmp.lt.s32.totalorder %s217_s23, %s217_s23 }
   0xd   :  { %p224_p6 = por %p223_p5, %p222_p4 }
   0xf   :  { %p225_p7 = pnand %p224_p6, %p218_p3 }
  0x11   :  { %228 = shalt.err (!%p225_p7)
}
  0x12   :  { %20 = dma.hbm_to_vmem [thread:$0]  %s350_s0, 256, %s18_s13, [#allocation3]  }
  0x13   :  { %s229_s28 = scalar_lea.hbm %s351_s1, 4096 }
  0x14   :  { %p230_p8 = scmp.ne.s32.totalorder %s351_s1, %s229_s28  ;;  %p233_p9 = scmp.lt.u32.totalorder %s229_s28, %s351_s1 }
  0x16   :  { %p235_p10 = pnand %p233_p9, %p230_p8 }
  0x18   :  { %238 = shalt.err (!%p235_p10)
}
  0x19   :  { %s239_s6 = scalar_lea.vmem %s304_s15, 4096  ;;  %p244_p12 = scmp.lt.s32.totalorder %s304_s15, %s304_s15 }
  0x1a   :  { %p240_p11 = scmp.ne.s32.totalorder %s304_s15, %s239_s6  ;;  %p245_p13 = scmp.lt.s32.totalorder %s239_s6, %s239_s6 }
  0x1c   :  { %p246_p0 = por %p245_p13, %p244_p12 }
  0x1e   :  { %p247_p1 = pnand %p246_p0, %p240_p11 }
  0x20   :  { %250 = shalt.err (!%p247_p1)
}
  0x21   :  { %s281_s0 = smov 256   ;;  %s282_s7 = smov 16  }
  0x22   :  { %32 = dma.hbm_to_vmem [thread:$0]  %s351_s1, 4096, %s304_s15, [#allocation6], %s281_s0, %s281_s0, %s282_s7  }
  0x23   :  { %273 = dma.done.wait [#allocation3], 256  }
  0x24   :  { %274 = vsyncadd [#allocation3], 4294967040 }
  0x25   :  { %275 = dma.done.wait [#allocation6], 4096  }
  0x26   :  { %276 = vsyncadd [#allocation6], 4294963200  ;;  %v44_v0 = vld [vmem:[#allocation5 + $0x8] sm:$0xff]  ;;  %v46_v1 = vld [vmem:[#allocation5 + $0x18] sm:$0xff]  ;;  %s283_s11 = smov [#allocation7]  }
  0x27   :  { %v43_v2 = vld [vmem:[#allocation5] sm:$0xff]  ;;  %v170_v3 = vpack.c.bf16 %v46_v1, %v44_v0  ;;  %v45_v4 = vld [vmem:[#allocation5 + $0x10] sm:$0xff]  ;;  %v48_v5 = vld [vmem:[#allocation5 + $0x28] sm:$0xff]  ;;  %s159_s12 = sshll.u32 %s283_s11, 4  ;;  %s160_s12 = int_to_ptr.vmem [resolvable:$true] %s159_s12 }
  0x28   :  { %v50_v6 = vld [vmem:[#allocation5 + $0x38] sm:$0xff]  ;;  %v172_v7 = vpack.c.bf16 %v45_v4, %v43_v2  ;;  %v47_v9 = vld [vmem:[#allocation5 + $0x20] sm:$0xff]  ;;  %v49_v10 = vld [vmem:[#allocation5 + $0x30] sm:$0xff]  ;;  %s251_s13 = scalar_lea.vmem %s160_s12, 128  ;;  %p256_p3 = scmp.lt.s32.totalorder %s160_s12, %s160_s12 }
  0x29   :  { %v174_v8 = vpack.c.bf16 %v50_v6, %v48_v5  ;;  %171 = vmatprep.subr.bf16.mxu0 %v170_v3  ;;  %v52_v11 = vld [vmem:[#allocation5 + $0x48] sm:$0xff]  ;;  %v54_v12 = vld [vmem:[#allocation5 + $0x58] sm:$0xff]  ;;  %v176_v13 = vpack.c.bf16 %v49_v10, %v47_v9  ;;  %v51_v16 = vld [vmem:[#allocation5 + $0x40] sm:$0xff]  ;;  %p252_p2 = scmp.ne.s32.totalorder %s160_s12, %s251_s13  ;;  %p257_p4 = scmp.lt.s32.totalorder %s251_s13, %s251_s13 }
  0x2a   :  { %173 = vmatpush1.bf16.xpose.msra.mxu0 %v172_v7  ;;  %v178_v14 = vpack.c.bf16 %v54_v12, %v52_v11  ;;  %v42_v15 = vld [vmem:[#allocation2 + $0x8] sm:$0xff]  ;;  %v53_v17 = vld [vmem:[#allocation5 + $0x50] sm:$0xff]  ;;  %v56_v18 = vld [vmem:[#allocation5 + $0x68] sm:$0xff] }
  0x2b   :  { %175 = vmatprep.subr.bf16.mxu0 %v174_v8  ;;  %146 = vmatprep.mubr.f32.mxu0 %v42_v15  ;;  %v58_v19 = vld [vmem:[#allocation5 + $0x78] sm:$0xff]  ;;  %v180_v20 = vpack.c.bf16 %v53_v17, %v51_v16  ;;  %v55_v22 = vld [vmem:[#allocation5 + $0x60] sm:$0xff]  ;;  %v57_v23 = vld [vmem:[#allocation5 + $0x70] sm:$0xff]  ;;  %p258_p5 = por %p257_p4, %p256_p3 }
  0x2c   :  { %v182_v21 = vpack.c.bf16 %v58_v19, %v56_v18  ;;  %v60_v24 = vld [vmem:[#allocation5 + $0x88] sm:$0xff]  ;;  %v62_v25 = vld [vmem:[#allocation5 + $0x98] sm:$0xff]  ;;  %v184_v26 = vpack.c.bf16 %v57_v23, %v55_v22  ;;  %v59_v28 = vld [vmem:[#allocation5 + $0x80] sm:$0xff] }
  0x2d   :  { %v186_v27 = vpack.c.bf16 %v62_v25, %v60_v24  ;;  %v61_v29 = vld [vmem:[#allocation5 + $0x90] sm:$0xff]  ;;  %v64_v30 = vld [vmem:[#allocation5 + $0xa8] sm:$0xff]  ;;  %v66_v31 = vld [vmem:[#allocation5 + $0xb8] sm:$0xff]  ;;  %p259_p6 = pnand %p258_p5, %p252_p2 }
  0x2e   :  { %v188_v32 = vpack.c.bf16 %v61_v29, %v59_v28  ;;  %v190_v33 = vpack.c.bf16 %v66_v31, %v64_v30  ;;  %v63_v34 = vld [vmem:[#allocation5 + $0xa0] sm:$0xff]  ;;  %v65_v35 = vld [vmem:[#allocation5 + $0xb0] sm:$0xff]  ;;  %v68_v36 = vld [vmem:[#allocation5 + $0xc8] sm:$0xff] }
  0x2f   :  { %v70_v37 = vld [vmem:[#allocation5 + $0xd8] sm:$0xff]  ;;  %v192_v38 = vpack.c.bf16 %v65_v35, %v63_v34  ;;  %v67_v40 = vld [vmem:[#allocation5 + $0xc0] sm:$0xff]  ;;  %v69_v41 = vld [vmem:[#allocation5 + $0xd0] sm:$0xff] }
  0x30   :  { %v194_v39 = vpack.c.bf16 %v70_v37, %v68_v36  ;;  %v72_v42 = vld [vmem:[#allocation5 + $0xe8] sm:$0xff]  ;;  %v74_v43 = vld [vmem:[#allocation5 + $0xf8] sm:$0xff]  ;;  %v196_v44 = vpack.c.bf16 %v69_v41, %v67_v40  ;;  %v71_v46 = vld [vmem:[#allocation5 + $0xe0] sm:$0xff] }
  0x31   :  { %v198_v45 = vpack.c.bf16 %v74_v43, %v72_v42  ;;  %v73_v47 = vld [vmem:[#allocation5 + $0xf0] sm:$0xff] }
  0x32   :  { %177 = vmatpush1.bf16.xpose.msra.mxu0 %v176_v13  ;;  %v200_v48 = vpack.c.bf16 %v73_v47, %v71_v46  ;;  %v41_v49 = vld [vmem:[#allocation2] sm:$0xff] }
  0x33   :  { %179 = vmatprep.subr.bf16.mxu0 %v178_v14  ;;  %v169_v50 = vld [vmem:[%s352_s2] ss:$0 sm:$0xff] }
  0x3a   :  { %181 = vmatpush1.bf16.xpose.msra.mxu0 %v180_v20 }
  0x3b   :  { %183 = vmatprep.subr.bf16.mxu0 %v182_v21 }
  0x42   :  { %185 = vmatpush1.bf16.xpose.msra.mxu0 %v184_v26 }
  0x43   :  { %187 = vmatprep.subr.bf16.mxu0 %v186_v27 }
  0x4a   :  { %189 = vmatpush1.bf16.xpose.msra.mxu0 %v188_v32 }
  0x4b   :  { %191 = vmatprep.subr.bf16.mxu0 %v190_v33 }
  0x52   :  { %193 = vmatpush1.bf16.xpose.msra.mxu0 %v192_v38 }
  0x53   :  { %195 = vmatprep.subr.bf16.mxu0 %v194_v39 }
  0x5a   :  { %197 = vmatpush1.bf16.xpose.msra.mxu0 %v196_v44 }
  0x5b   :  { %199 = vmatprep.subr.bf16.mxu0 %v198_v45 }
  0x62   :  { %201 = vmatpush1.bf16.xpose.msra.mxu0 %v200_v48 }
  0x69   :  { %147 = vmatmul.mubr.f32.vlgmr.msra.gmra.mrb[0].mxu0 %v41_v49 }
 0x13c   :  { %v148_v51 = vpop.f32.mrb[0].mxu0 }
 0x13d   :  { %v149_v52 = vadd.f32 %v169_v50, %v148_v51  ;;  %v150_v53 = vpop.f32.mrb[1].mxu0 }
 0x13f   :  { %152 = vst [vmem:[#allocation7] sm:$0xff] %v149_v52 }
 0x140   :  { %262 = shalt.err (!%p259_p6)
}
 0x141   :  { %s263_s16 = scalar_lea.hbm %s353_s3, 128 }
 0x142   :  { %p264_p7 = scmp.ne.s32.totalorder %s353_s3, %s263_s16  ;;  %p267_p8 = scmp.lt.u32.totalorder %s263_s16, %s353_s3 }
 0x144   :  { %p269_p9 = pnand %p267_p8, %p264_p7 }
 0x146   :  { %272 = shalt.err (!%p269_p9)
}
 0x147   :  { %162 = dma.vmem_to_hbm [thread:$0]  %s160_s12, 128, %s353_s3, [#allocation4]  }
 0x148   :  { %277 = dma.done.wait [#allocation4], 128  }
 0x149   :  { %278 = vsyncadd [#allocation4], 4294967168 }
 0x14a   :  { %166 = vsyncpa [#allocation3], 1 }
 0x14b   :  { %167 = vsyncpa [#allocation6], 1 }
 0x14c   :  { %168 = vsyncpa [#allocation4], 1 }

</bundles_post_ra>
